<compile_context>
chip_gen: v5e
topology: v5e:2x2
jax: 0.10.0
libtpu: 0.0.40
codegen_flags: <defaults>
</compile_context>

<pallas_src>
import functools

import jax
import jax.numpy as jnp
from jax.experimental import pallas as pl
from jax.experimental.pallas import tpu as pltpu


def _round_up(x, m):
    return (x + m - 1) // m * m


# --------------------------------------------------------------------------------------
# Fused kernel: input projection + serial recurrence + output FC for one time block.
# Grid = (batch_tiles [parallel], time_blocks [arbitrary/sequential]).
# --------------------------------------------------------------------------------------
def _fused_rnn_kernel(x_ref, wih_ref, whh_ref, wfc_ref, brnn_ref, bfc_ref,
                      out_ref, buf_ref, h_state,
                      *, tblk, bt, i_dim, hp, op, unroll):
    # x_ref:   (T, bt, I)      time-major input block
    # w*_ref:  resident weights (I,Hp), (Hp,Hp), (Hp,Op); b*: (1,Hp), (1,Op)
    # out_ref: (T, bt, Op)
    # buf_ref: (T, bt, Hp)     VMEM scratch: holds pre_t, then overwritten with h_t
    # h_state: (bt, Hp)        hidden state carried across time blocks

    @pl.when(pl.program_id(1) == 0)       # start of each batch tile's time sweep
    def _():
        h_state[...] = jnp.zeros_like(h_state)

    wih = wih_ref[...]
    whh = whh_ref[...]
    wfc = wfc_ref[...]

    # --- Phase A: pre_t = x_t @ W_ih^T + (b_ih + b_hh) for the whole block ------------
    x2 = x_ref[...].reshape(tblk * bt, i_dim)
    pre = jnp.dot(x2.astype(wih.dtype), wih,
                  preferred_element_type=jnp.float32) + brnn_ref[...]
    buf_ref[...] = pre.reshape(tblk, bt, hp)

    # --- Phase B: serial recurrence (only h @ W_hh^T + tanh on the critical path) -----
    def step(j, h):
        h_new = jnp.tanh(
            buf_ref[j]
            + jnp.dot(h.astype(whh.dtype), whh, preferred_element_type=jnp.float32))
        buf_ref[j] = h_new                 # reuse the pre buffer to hold h_t
        return h_new

    h_state[...] = jax.lax.fori_loop(0, tblk, step, h_state[...], unroll=unroll)

    # --- Phase C: out_t = h_t @ W_fc^T + b_fc for the whole block ----------------------
    h2 = buf_ref[...].reshape(tblk * bt, hp)
    out = jnp.dot(h2.astype(wfc.dtype), wfc,
                  preferred_element_type=jnp.float32) + bfc_ref[...]
    out_ref[...] = out.reshape(tblk, bt, op).astype(out_ref.dtype)


# --------------------------------------------------------------------------------------
# Wrapper
# --------------------------------------------------------------------------------------
def many_to_many_rnn(x_bsi, w_ih, w_hh, b_ih, b_hh, w_fc, b_fc,
                     *, param_dtype=jnp.float32, batch_tile=None,
                     vmem_block_budget=12 * 1024 * 1024):
    """x_bsi: (B, S, I).  PyTorch weight layout:
       w_ih (H, I), w_hh (H, H), b_ih (H,), b_hh (H,), w_fc (O, H), b_fc (O,)."""
    B, S, I = x_bsi.shape
    H = w_hh.shape[0]
    O = w_fc.shape[0]
    f32 = jnp.float32

    # Lane-dense padding for hidden / output dims (unmasked vector stores).
    Hp = _round_up(H, 128)
    Op = _round_up(O, 128)

    # Batch tiling: optional leading parallel grid axis (2nd TensorCore on v7x).
    if batch_tile is None or batch_tile >= B:
        bt, nb, Bp = B, 1, B
    else:
        bt = _round_up(batch_tile, 8)      # block second-minor dim must be 8-aligned
        Bp = _round_up(B, bt)
        nb = Bp // bt

    # Time-block size from a VMEM budget (x block + out block double-buffered,
    # plus the pre/h scratch), so blocks are large enough to hit HBM roofline
    # while staying within scoped VMEM on every generation (v7x has 64 MiB).
    per_t = bt * 4 * (2 * I + 2 * Op + Hp)
    T = max(vmem_block_budget // per_t, 8)
    if T >= S:
        T, Sp = S, S                       # single block, no sequence padding
    else:
        T = max((T // 8) * 8, 8)
        Sp = _round_up(S, T)
    n_tblk = Sp // T
    unroll = True if T <= 16 else 8        # avoid vreg-pressure blowup at large T

    # Time-major, zero-padded input (single small copy of x; the inflated HBM
    # intermediates of the unfused version are gone entirely).
    x_tm = jnp.zeros((Sp, Bp, I), f32).at[:S, :B, :].set(
        jnp.swapaxes(x_bsi.astype(f32), 0, 1))

    # Zero-padded weights: padded hidden columns stay exactly 0 through the recurrence.
    wih_p = jnp.zeros((I, Hp), param_dtype).at[:, :H].set(w_ih.T.astype(param_dtype))
    whh_p = jnp.zeros((Hp, Hp), param_dtype).at[:H, :H].set(w_hh.T.astype(param_dtype))
    wfc_p = jnp.zeros((Hp, Op), param_dtype).at[:H, :O].set(w_fc.T.astype(param_dtype))
    b_rnn = jnp.zeros((1, Hp), f32).at[0, :H].set((b_ih + b_hh).astype(f32))
    b_out = jnp.zeros((1, Op), f32).at[0, :O].set(b_fc.astype(f32))

    def resident(shape):
        """Resident block (constant index_map): single-buffered if supported."""
        idx = lambda b, t, _n=len(shape): (0,) * _n
        if hasattr(pl, "Buffered"):
            try:
                return pl.BlockSpec(shape, idx, pipeline_mode=pl.Buffered(1))
            except (TypeError, ValueError):
                pass
        return pl.BlockSpec(shape, idx)

    out_pad = pl.pallas_call(
        functools.partial(_fused_rnn_kernel,
                          tblk=T, bt=bt, i_dim=I, hp=Hp, op=Op, unroll=unroll),
        out_shape=jax.ShapeDtypeStruct((Sp, Bp, Op), f32),
        grid_spec=pltpu.PrefetchScalarGridSpec(
            num_scalar_prefetch=0,
            grid=(nb, n_tblk),
            in_specs=[
                pl.BlockSpec((T, bt, I), lambda b, t: (t, b, 0)),   # x time block
                resident((I, Hp)),                                  # W_ih^T
                resident((Hp, Hp)),                                 # W_hh^T
                resident((Hp, Op)),                                 # W_fc^T
                resident((1, Hp)),                                  # b_ih + b_hh
                resident((1, Op)),                                  # b_fc
            ],
            out_specs=pl.BlockSpec((T, bt, Op), lambda b, t: (t, b, 0)),
            scratch_shapes=[
                pltpu.VMEM((T, bt, Hp), f32),    # pre_t -> h_t buffer for the block
                pltpu.VMEM((bt, Hp), f32),       # carried hidden state
            ],
        ),
        compiler_params=pltpu.CompilerParams(
            dimension_semantics=("parallel", "arbitrary"),
            vmem_limit_bytes=48 * 1024 * 1024),
    )(x_tm, wih_p, whh_p, wfc_p, b_rnn, b_out)

    # Strip padding; the (S,B)->(B,S) swap fuses into this small unavoidable copy.
    return jnp.swapaxes(out_pad[:S, :B, :O], 0, 1)


# --------------------------------------------------------------------------------------
# Pure-JAX reference of the PyTorch forward
# --------------------------------------------------------------------------------------
def reference_rnn(x_bsi, w_ih, w_hh, b_ih, b_hh, w_fc, b_fc):
    B, S, I = x_bsi.shape
    H = w_hh.shape[0]

    def step(h, x_t):
        h_new = jnp.tanh(x_t @ w_ih.T + b_ih + h @ w_hh.T + b_hh)
        return h_new, h_new

    x_sbi = jnp.transpose(x_bsi, (1, 0, 2))
    _, hs = jax.lax.scan(step, jnp.zeros((B, H), jnp.float32), x_sbi)
    out = hs @ w_fc.T + b_fc                                     # (S, B, O)
    return jnp.transpose(out, (1, 0, 2))


if __name__ == "__main__":
    # Small shapes consistent with the module (hidden_size=10 in the spec).
    B, S, I, H, O = 2, 12, 16, 10, 4

    key = jax.random.PRNGKey(0)
    ks = jax.random.split(key, 7)
    bound = 1.0 / jnp.sqrt(H)

    x = jax.random.normal(ks[0], (B, S, I), dtype=jnp.float32)
    w_ih = jax.random.uniform(ks[1], (H, I), jnp.float32, -bound, bound)
    w_hh = jax.random.uniform(ks[2], (H, H), jnp.float32, -bound, bound)
    b_ih = jax.random.uniform(ks[3], (H,), jnp.float32, -bound, bound)
    b_hh = jax.random.uniform(ks[4], (H,), jnp.float32, -bound, bound)
    w_fc = jax.random.uniform(ks[5], (O, H), jnp.float32, -bound, bound)
    b_fc = jax.random.uniform(ks[6], (O,), jnp.float32, -bound, bound)

    out = many_to_many_rnn(x, w_ih, w_hh, b_ih, b_hh, w_fc, b_fc)
    out = jax.block_until_ready(out)

    ref = reference_rnn(x, w_ih, w_hh, b_ih, b_hh, w_fc, b_fc)
    assert out.shape == (B, S, O), f"bad shape {out.shape}"
    assert jnp.allclose(out, ref, atol=1e-4, rtol=1e-4), "mismatch vs reference"

    print("KERNEL_OK")
</pallas_src>

<mosaic_0001>
module attributes {stable_mosaic.version = 11 : i64} {
  func.func @_fused_rnn_kernel(%arg0: i32, %arg1: i32, %arg2: memref<12x2x16xf32, #tpu.memory_space<vmem>>, %arg3: memref<16x128xf32, #tpu.memory_space<vmem>>, %arg4: memref<128x128xf32, #tpu.memory_space<vmem>>, %arg5: memref<128x128xf32, #tpu.memory_space<vmem>>, %arg6: memref<1x128xf32, #tpu.memory_space<vmem>>, %arg7: memref<1x128xf32, #tpu.memory_space<vmem>>, %arg8: memref<12x2x128xf32, #tpu.memory_space<vmem>>, %arg9: memref<12x2x128xf32, #tpu.memory_space<vmem>>, %arg10: memref<2x128xf32, #tpu.memory_space<vmem>>) attributes {dimension_semantics = [#tpu.dimension_semantics<parallel>, #tpu.dimension_semantics<arbitrary>], iteration_bounds = array<i64: 1, 1>, scalar_prefetch = 0 : i64, scratch_operands = 2 : i64, tpu.core_type = #tpu.core_type<tc>, window_params = [{transform_indices = @transform_0, window_bounds = array<i64: 12, 2, 16>}, {pipeline_mode = #tpu.pipeline_mode<synchronous>, transform_indices = @transform_1, window_bounds = array<i64: 16, 128>}, {pipeline_mode = #tpu.pipeline_mode<synchronous>, transform_indices = @transform_2, window_bounds = array<i64: 128, 128>}, {pipeline_mode = #tpu.pipeline_mode<synchronous>, transform_indices = @transform_3, window_bounds = array<i64: 128, 128>}, {pipeline_mode = #tpu.pipeline_mode<synchronous>, transform_indices = @transform_4, window_bounds = array<i64: 1, 128>}, {pipeline_mode = #tpu.pipeline_mode<synchronous>, transform_indices = @transform_5, window_bounds = array<i64: 1, 128>}, {transform_indices = @transform_6, window_bounds = array<i64: 12, 2, 128>}]} {
    %c0_i32 = arith.constant 0 : i32
    %0 = arith.cmpi eq, %arg1, %c0_i32 : i32
    %1 = arith.extui %0 : i1 to i32
    %c0_i32_0 = arith.constant 0 : i32
    %2 = arith.cmpi ne, %1, %c0_i32_0 : i32
    scf.if %2 {
      %cst_88 = arith.constant 0.000000e+00 : f32
      %144 = vector.broadcast %cst_88 : f32 to vector<2x128xf32>
      %c0_89 = arith.constant 0 : index
      %c0_90 = arith.constant 0 : index
      %145 = vector.load %arg10[%c0_89, %c0_90] : memref<2x128xf32, #tpu.memory_space<vmem>>, vector<2x128xf32>
      tpu.vector_store %arg10[%c0_89, %c0_90], %144 {strides = array<i32>} : memref<2x128xf32, #tpu.memory_space<vmem>>, vector<2x128xf32>,
    } else {
    }
    %c0 = arith.constant 0 : index
    %c0_1 = arith.constant 0 : index
    %3 = vector.load %arg3[%c0, %c0_1] : memref<16x128xf32, #tpu.memory_space<vmem>>, vector<16x128xf32>
    %c0_2 = arith.constant 0 : index
    %c0_3 = arith.constant 0 : index
    %4 = vector.load %arg4[%c0_2, %c0_3] : memref<128x128xf32, #tpu.memory_space<vmem>>, vector<128x128xf32>
    %c0_4 = arith.constant 0 : index
    %c0_5 = arith.constant 0 : index
    %5 = vector.load %arg5[%c0_4, %c0_5] : memref<128x128xf32, #tpu.memory_space<vmem>>, vector<128x128xf32>
    %c0_6 = arith.constant 0 : index
    %c0_7 = arith.constant 0 : index
    %c0_8 = arith.constant 0 : index
    %6 = vector.load %arg2[%c0_6, %c0_7, %c0_8] : memref<12x2x16xf32, #tpu.memory_space<vmem>>, vector<12x2x16xf32>
    %7 = vector.shape_cast %6 : vector<12x2x16xf32> to vector<24x16xf32>
    %cst = arith.constant dense<0.000000e+00> : vector<24x128xf32>
    %8 = tpu.matmul %7, %3, %cst {dimension_numbers = #tpu.dot_dimension_numbers<[1], [0], [0], [1], [0, 0, 1, 1], [], []>} : vector<24x16xf32>, vector<16x128xf32>, vector<24x128xf32> -> vector<24x128xf32>
    %c0_9 = arith.constant 0 : index
    %c0_10 = arith.constant 0 : index
    %9 = vector.load %arg6[%c0_9, %c0_10] : memref<1x128xf32, #tpu.memory_space<vmem>>, vector<1x128xf32>
    %10 = vector.broadcast %9 : vector<1x128xf32> to vector<24x128xf32>
    %11 = arith.addf %8, %10 : vector<24x128xf32>
    %12 = vector.shape_cast %11 : vector<24x128xf32> to vector<12x2x128xf32>
    %c0_11 = arith.constant 0 : index
    %c0_12 = arith.constant 0 : index
    %c0_13 = arith.constant 0 : index
    %13 = vector.load %arg9[%c0_11, %c0_12, %c0_13] : memref<12x2x128xf32, #tpu.memory_space<vmem>>, vector<12x2x128xf32>
    tpu.vector_store %arg9[%c0_11, %c0_12, %c0_13], %12 {strides = array<i32>} : memref<12x2x128xf32, #tpu.memory_space<vmem>>, vector<12x2x128xf32>,
    %c0_14 = arith.constant 0 : index
    %c0_15 = arith.constant 0 : index
    %14 = vector.load %arg10[%c0_14, %c0_15] : memref<2x128xf32, #tpu.memory_space<vmem>>, vector<2x128xf32>
    %c0_i32_16 = arith.constant 0 : i32
    %15 = arith.index_cast %c0_i32_16 : i32 to index
    %c0_17 = arith.constant 0 : index
    %c0_18 = arith.constant 0 : index
    %16 = vector.load %arg9[%15, %c0_17, %c0_18] : memref<12x2x128xf32, #tpu.memory_space<vmem>>, vector<1x2x128xf32>
    %17 = vector.shape_cast %16 : vector<1x2x128xf32> to vector<2x128xf32>
    %cst_19 = arith.constant dense<0.000000e+00> : vector<2x128xf32>
    %18 = tpu.matmul %14, %4, %cst_19 {dimension_numbers = #tpu.dot_dimension_numbers<[1], [0], [0], [1], [0, 0, 1, 1], [], []>} : vector<2x128xf32>, vector<128x128xf32>, vector<2x128xf32> -> vector<2x128xf32>
    %19 = arith.addf %17, %18 : vector<2x128xf32>
    %20 = math.tanh %19 : vector<2x128xf32>
    %21 = arith.index_cast %c0_i32_16 : i32 to index
    %c0_20 = arith.constant 0 : index
    %c0_21 = arith.constant 0 : index
    %22 = vector.load %arg9[%21, %c0_20, %c0_21] : memref<12x2x128xf32, #tpu.memory_space<vmem>>, vector<1x2x128xf32>
    %23 = vector.shape_cast %22 : vector<1x2x128xf32> to vector<2x128xf32>
    %24 = vector.shape_cast %20 : vector<2x128xf32> to vector<1x2x128xf32>
    tpu.vector_store %arg9[%21, %c0_20, %c0_21], %24 {strides = array<i32>} : memref<12x2x128xf32, #tpu.memory_space<vmem>>, vector<1x2x128xf32>,
    %c1_i32 = arith.constant 1 : i32
    %25 = arith.index_cast %c1_i32 : i32 to index
    %c0_22 = arith.constant 0 : index
    %c0_23 = arith.constant 0 : index
    %26 = vector.load %arg9[%25, %c0_22, %c0_23] : memref<12x2x128xf32, #tpu.memory_space<vmem>>, vector<1x2x128xf32>
    %27 = vector.shape_cast %26 : vector<1x2x128xf32> to vector<2x128xf32>
    %cst_24 = arith.constant dense<0.000000e+00> : vector<2x128xf32>
    %28 = tpu.matmul %20, %4, %cst_24 {dimension_numbers = #tpu.dot_dimension_numbers<[1], [0], [0], [1], [0, 0, 1, 1], [], []>} : vector<2x128xf32>, vector<128x128xf32>, vector<2x128xf32> -> vector<2x128xf32>
    %29 = arith.addf %27, %28 : vector<2x128xf32>
    %30 = math.tanh %29 : vector<2x128xf32>
    %31 = arith.index_cast %c1_i32 : i32 to index
    %c0_25 = arith.constant 0 : index
    %c0_26 = arith.constant 0 : index
    %32 = vector.load %arg9[%31, %c0_25, %c0_26] : memref<12x2x128xf32, #tpu.memory_space<vmem>>, vector<1x2x128xf32>
    %33 = vector.shape_cast %32 : vector<1x2x128xf32> to vector<2x128xf32>
    %34 = vector.shape_cast %30 : vector<2x128xf32> to vector<1x2x128xf32>
    tpu.vector_store %arg9[%31, %c0_25, %c0_26], %34 {strides = array<i32>} : memref<12x2x128xf32, #tpu.memory_space<vmem>>, vector<1x2x128xf32>,
    %c2_i32 = arith.constant 2 : i32
    %35 = arith.index_cast %c2_i32 : i32 to index
    %c0_27 = arith.constant 0 : index
    %c0_28 = arith.constant 0 : index
    %36 = vector.load %arg9[%35, %c0_27, %c0_28] : memref<12x2x128xf32, #tpu.memory_space<vmem>>, vector<1x2x128xf32>
    %37 = vector.shape_cast %36 : vector<1x2x128xf32> to vector<2x128xf32>
    %cst_29 = arith.constant dense<0.000000e+00> : vector<2x128xf32>
    %38 = tpu.matmul %30, %4, %cst_29 {dimension_numbers = #tpu.dot_dimension_numbers<[1], [0], [0], [1], [0, 0, 1, 1], [], []>} : vector<2x128xf32>, vector<128x128xf32>, vector<2x128xf32> -> vector<2x128xf32>
    %39 = arith.addf %37, %38 : vector<2x128xf32>
    %40 = math.tanh %39 : vector<2x128xf32>
    %41 = arith.index_cast %c2_i32 : i32 to index
    %c0_30 = arith.constant 0 : index
    %c0_31 = arith.constant 0 : index
    %42 = vector.load %arg9[%41, %c0_30, %c0_31] : memref<12x2x128xf32, #tpu.memory_space<vmem>>, vector<1x2x128xf32>
    %43 = vector.shape_cast %42 : vector<1x2x128xf32> to vector<2x128xf32>
    %44 = vector.shape_cast %40 : vector<2x128xf32> to vector<1x2x128xf32>
    tpu.vector_store %arg9[%41, %c0_30, %c0_31], %44 {strides = array<i32>} : memref<12x2x128xf32, #tpu.memory_space<vmem>>, vector<1x2x128xf32>,
    %c3_i32 = arith.constant 3 : i32
    %45 = arith.index_cast %c3_i32 : i32 to index
    %c0_32 = arith.constant 0 : index
    %c0_33 = arith.constant 0 : index
    %46 = vector.load %arg9[%45, %c0_32, %c0_33] : memref<12x2x128xf32, #tpu.memory_space<vmem>>, vector<1x2x128xf32>
    %47 = vector.shape_cast %46 : vector<1x2x128xf32> to vector<2x128xf32>
    %cst_34 = arith.constant dense<0.000000e+00> : vector<2x128xf32>
    %48 = tpu.matmul %40, %4, %cst_34 {dimension_numbers = #tpu.dot_dimension_numbers<[1], [0], [0], [1], [0, 0, 1, 1], [], []>} : vector<2x128xf32>, vector<128x128xf32>, vector<2x128xf32> -> vector<2x128xf32>
    %49 = arith.addf %47, %48 : vector<2x128xf32>
    %50 = math.tanh %49 : vector<2x128xf32>
    %51 = arith.index_cast %c3_i32 : i32 to index
    %c0_35 = arith.constant 0 : index
    %c0_36 = arith.constant 0 : index
    %52 = vector.load %arg9[%51, %c0_35, %c0_36] : memref<12x2x128xf32, #tpu.memory_space<vmem>>, vector<1x2x128xf32>
    %53 = vector.shape_cast %52 : vector<1x2x128xf32> to vector<2x128xf32>
    %54 = vector.shape_cast %50 : vector<2x128xf32> to vector<1x2x128xf32>
    tpu.vector_store %arg9[%51, %c0_35, %c0_36], %54 {strides = array<i32>} : memref<12x2x128xf32, #tpu.memory_space<vmem>>, vector<1x2x128xf32>,
    %c4_i32 = arith.constant 4 : i32
    %55 = arith.index_cast %c4_i32 : i32 to index
    %c0_37 = arith.constant 0 : index
    %c0_38 = arith.constant 0 : index
    %56 = vector.load %arg9[%55, %c0_37, %c0_38] : memref<12x2x128xf32, #tpu.memory_space<vmem>>, vector<1x2x128xf32>
    %57 = vector.shape_cast %56 : vector<1x2x128xf32> to vector<2x128xf32>
    %cst_39 = arith.constant dense<0.000000e+00> : vector<2x128xf32>
    %58 = tpu.matmul %50, %4, %cst_39 {dimension_numbers = #tpu.dot_dimension_numbers<[1], [0], [0], [1], [0, 0, 1, 1], [], []>} : vector<2x128xf32>, vector<128x128xf32>, vector<2x128xf32> -> vector<2x128xf32>
    %59 = arith.addf %57, %58 : vector<2x128xf32>
    %60 = math.tanh %59 : vector<2x128xf32>
    %61 = arith.index_cast %c4_i32 : i32 to index
    %c0_40 = arith.constant 0 : index
    %c0_41 = arith.constant 0 : index
    %62 = vector.load %arg9[%61, %c0_40, %c0_41] : memref<12x2x128xf32, #tpu.memory_space<vmem>>, vector<1x2x128xf32>
    %63 = vector.shape_cast %62 : vector<1x2x128xf32> to vector<2x128xf32>
    %64 = vector.shape_cast %60 : vector<2x128xf32> to vector<1x2x128xf32>
    tpu.vector_store %arg9[%61, %c0_40, %c0_41], %64 {strides = array<i32>} : memref<12x2x128xf32, #tpu.memory_space<vmem>>, vector<1x2x128xf32>,
    %c5_i32 = arith.constant 5 : i32
    %65 = arith.index_cast %c5_i32 : i32 to index
    %c0_42 = arith.constant 0 : index
    %c0_43 = arith.constant 0 : index
    %66 = vector.load %arg9[%65, %c0_42, %c0_43] : memref<12x2x128xf32, #tpu.memory_space<vmem>>, vector<1x2x128xf32>
    %67 = vector.shape_cast %66 : vector<1x2x128xf32> to vector<2x128xf32>
    %cst_44 = arith.constant dense<0.000000e+00> : vector<2x128xf32>
    %68 = tpu.matmul %60, %4, %cst_44 {dimension_numbers = #tpu.dot_dimension_numbers<[1], [0], [0], [1], [0, 0, 1, 1], [], []>} : vector<2x128xf32>, vector<128x128xf32>, vector<2x128xf32> -> vector<2x128xf32>
    %69 = arith.addf %67, %68 : vector<2x128xf32>
    %70 = math.tanh %69 : vector<2x128xf32>
    %71 = arith.index_cast %c5_i32 : i32 to index
    %c0_45 = arith.constant 0 : index
    %c0_46 = arith.constant 0 : index
    %72 = vector.load %arg9[%71, %c0_45, %c0_46] : memref<12x2x128xf32, #tpu.memory_space<vmem>>, vector<1x2x128xf32>
    %73 = vector.shape_cast %72 : vector<1x2x128xf32> to vector<2x128xf32>
    %74 = vector.shape_cast %70 : vector<2x128xf32> to vector<1x2x128xf32>
    tpu.vector_store %arg9[%71, %c0_45, %c0_46], %74 {strides = array<i32>} : memref<12x2x128xf32, #tpu.memory_space<vmem>>, vector<1x2x128xf32>,
    %c6_i32 = arith.constant 6 : i32
    %75 = arith.index_cast %c6_i32 : i32 to index
    %c0_47 = arith.constant 0 : index
    %c0_48 = arith.constant 0 : index
    %76 = vector.load %arg9[%75, %c0_47, %c0_48] : memref<12x2x128xf32, #tpu.memory_space<vmem>>, vector<1x2x128xf32>
    %77 = vector.shape_cast %76 : vector<1x2x128xf32> to vector<2x128xf32>
    %cst_49 = arith.constant dense<0.000000e+00> : vector<2x128xf32>
    %78 = tpu.matmul %70, %4, %cst_49 {dimension_numbers = #tpu.dot_dimension_numbers<[1], [0], [0], [1], [0, 0, 1, 1], [], []>} : vector<2x128xf32>, vector<128x128xf32>, vector<2x128xf32> -> vector<2x128xf32>
    %79 = arith.addf %77, %78 : vector<2x128xf32>
    %80 = math.tanh %79 : vector<2x128xf32>
    %81 = arith.index_cast %c6_i32 : i32 to index
    %c0_50 = arith.constant 0 : index
    %c0_51 = arith.constant 0 : index
    %82 = vector.load %arg9[%81, %c0_50, %c0_51] : memref<12x2x128xf32, #tpu.memory_space<vmem>>, vector<1x2x128xf32>
    %83 = vector.shape_cast %82 : vector<1x2x128xf32> to vector<2x128xf32>
    %84 = vector.shape_cast %80 : vector<2x128xf32> to vector<1x2x128xf32>
    tpu.vector_store %arg9[%81, %c0_50, %c0_51], %84 {strides = array<i32>} : memref<12x2x128xf32, #tpu.memory_space<vmem>>, vector<1x2x128xf32>,
    %c7_i32 = arith.constant 7 : i32
    %85 = arith.index_cast %c7_i32 : i32 to index
    %c0_52 = arith.constant 0 : index
    %c0_53 = arith.constant 0 : index
    %86 = vector.load %arg9[%85, %c0_52, %c0_53] : memref<12x2x128xf32, #tpu.memory_space<vmem>>, vector<1x2x128xf32>
    %87 = vector.shape_cast %86 : vector<1x2x128xf32> to vector<2x128xf32>
    %cst_54 = arith.constant dense<0.000000e+00> : vector<2x128xf32>
    %88 = tpu.matmul %80, %4, %cst_54 {dimension_numbers = #tpu.dot_dimension_numbers<[1], [0], [0], [1], [0, 0, 1, 1], [], []>} : vector<2x128xf32>, vector<128x128xf32>, vector<2x128xf32> -> vector<2x128xf32>
    %89 = arith.addf %87, %88 : vector<2x128xf32>
    %90 = math.tanh %89 : vector<2x128xf32>
    %91 = arith.index_cast %c7_i32 : i32 to index
    %c0_55 = arith.constant 0 : index
    %c0_56 = arith.constant 0 : index
    %92 = vector.load %arg9[%91, %c0_55, %c0_56] : memref<12x2x128xf32, #tpu.memory_space<vmem>>, vector<1x2x128xf32>
    %93 = vector.shape_cast %92 : vector<1x2x128xf32> to vector<2x128xf32>
    %94 = vector.shape_cast %90 : vector<2x128xf32> to vector<1x2x128xf32>
    tpu.vector_store %arg9[%91, %c0_55, %c0_56], %94 {strides = array<i32>} : memref<12x2x128xf32, #tpu.memory_space<vmem>>, vector<1x2x128xf32>,
    %c8_i32 = arith.constant 8 : i32
    %95 = arith.index_cast %c8_i32 : i32 to index
    %c0_57 = arith.constant 0 : index
    %c0_58 = arith.constant 0 : index
    %96 = vector.load %arg9[%95, %c0_57, %c0_58] : memref<12x2x128xf32, #tpu.memory_space<vmem>>, vector<1x2x128xf32>
    %97 = vector.shape_cast %96 : vector<1x2x128xf32> to vector<2x128xf32>
    %cst_59 = arith.constant dense<0.000000e+00> : vector<2x128xf32>
    %98 = tpu.matmul %90, %4, %cst_59 {dimension_numbers = #tpu.dot_dimension_numbers<[1], [0], [0], [1], [0, 0, 1, 1], [], []>} : vector<2x128xf32>, vector<128x128xf32>, vector<2x128xf32> -> vector<2x128xf32>
    %99 = arith.addf %97, %98 : vector<2x128xf32>
    %100 = math.tanh %99 : vector<2x128xf32>
    %101 = arith.index_cast %c8_i32 : i32 to index
    %c0_60 = arith.constant 0 : index
    %c0_61 = arith.constant 0 : index
    %102 = vector.load %arg9[%101, %c0_60, %c0_61] : memref<12x2x128xf32, #tpu.memory_space<vmem>>, vector<1x2x128xf32>
    %103 = vector.shape_cast %102 : vector<1x2x128xf32> to vector<2x128xf32>
    %104 = vector.shape_cast %100 : vector<2x128xf32> to vector<1x2x128xf32>
    tpu.vector_store %arg9[%101, %c0_60, %c0_61], %104 {strides = array<i32>} : memref<12x2x128xf32, #tpu.memory_space<vmem>>, vector<1x2x128xf32>,
    %c9_i32 = arith.constant 9 : i32
    %105 = arith.index_cast %c9_i32 : i32 to index
    %c0_62 = arith.constant 0 : index
    %c0_63 = arith.constant 0 : index
    %106 = vector.load %arg9[%105, %c0_62, %c0_63] : memref<12x2x128xf32, #tpu.memory_space<vmem>>, vector<1x2x128xf32>
    %107 = vector.shape_cast %106 : vector<1x2x128xf32> to vector<2x128xf32>
    %cst_64 = arith.constant dense<0.000000e+00> : vector<2x128xf32>
    %108 = tpu.matmul %100, %4, %cst_64 {dimension_numbers = #tpu.dot_dimension_numbers<[1], [0], [0], [1], [0, 0, 1, 1], [], []>} : vector<2x128xf32>, vector<128x128xf32>, vector<2x128xf32> -> vector<2x128xf32>
    %109 = arith.addf %107, %108 : vector<2x128xf32>
    %110 = math.tanh %109 : vector<2x128xf32>
    %111 = arith.index_cast %c9_i32 : i32 to index
    %c0_65 = arith.constant 0 : index
    %c0_66 = arith.constant 0 : index
    %112 = vector.load %arg9[%111, %c0_65, %c0_66] : memref<12x2x128xf32, #tpu.memory_space<vmem>>, vector<1x2x128xf32>
    %113 = vector.shape_cast %112 : vector<1x2x128xf32> to vector<2x128xf32>
    %114 = vector.shape_cast %110 : vector<2x128xf32> to vector<1x2x128xf32>
    tpu.vector_store %arg9[%111, %c0_65, %c0_66], %114 {strides = array<i32>} : memref<12x2x128xf32, #tpu.memory_space<vmem>>, vector<1x2x128xf32>,
    %c10_i32 = arith.constant 10 : i32
    %115 = arith.index_cast %c10_i32 : i32 to index
    %c0_67 = arith.constant 0 : index
    %c0_68 = arith.constant 0 : index
    %116 = vector.load %arg9[%115, %c0_67, %c0_68] : memref<12x2x128xf32, #tpu.memory_space<vmem>>, vector<1x2x128xf32>
    %117 = vector.shape_cast %116 : vector<1x2x128xf32> to vector<2x128xf32>
    %cst_69 = arith.constant dense<0.000000e+00> : vector<2x128xf32>
    %118 = tpu.matmul %110, %4, %cst_69 {dimension_numbers = #tpu.dot_dimension_numbers<[1], [0], [0], [1], [0, 0, 1, 1], [], []>} : vector<2x128xf32>, vector<128x128xf32>, vector<2x128xf32> -> vector<2x128xf32>
    %119 = arith.addf %117, %118 : vector<2x128xf32>
    %120 = math.tanh %119 : vector<2x128xf32>
    %121 = arith.index_cast %c10_i32 : i32 to index
    %c0_70 = arith.constant 0 : index
    %c0_71 = arith.constant 0 : index
    %122 = vector.load %arg9[%121, %c0_70, %c0_71] : memref<12x2x128xf32, #tpu.memory_space<vmem>>, vector<1x2x128xf32>
    %123 = vector.shape_cast %122 : vector<1x2x128xf32> to vector<2x128xf32>
    %124 = vector.shape_cast %120 : vector<2x128xf32> to vector<1x2x128xf32>
    tpu.vector_store %arg9[%121, %c0_70, %c0_71], %124 {strides = array<i32>} : memref<12x2x128xf32, #tpu.memory_space<vmem>>, vector<1x2x128xf32>,
    %c11_i32 = arith.constant 11 : i32
    %125 = arith.index_cast %c11_i32 : i32 to index
    %c0_72 = arith.constant 0 : index
    %c0_73 = arith.constant 0 : index
    %126 = vector.load %arg9[%125, %c0_72, %c0_73] : memref<12x2x128xf32, #tpu.memory_space<vmem>>, vector<1x2x128xf32>
    %127 = vector.shape_cast %126 : vector<1x2x128xf32> to vector<2x128xf32>
    %cst_74 = arith.constant dense<0.000000e+00> : vector<2x128xf32>
    %128 = tpu.matmul %120, %4, %cst_74 {dimension_numbers = #tpu.dot_dimension_numbers<[1], [0], [0], [1], [0, 0, 1, 1], [], []>} : vector<2x128xf32>, vector<128x128xf32>, vector<2x128xf32> -> vector<2x128xf32>
    %129 = arith.addf %127, %128 : vector<2x128xf32>
    %130 = math.tanh %129 : vector<2x128xf32>
    %131 = arith.index_cast %c11_i32 : i32 to index
    %c0_75 = arith.constant 0 : index
    %c0_76 = arith.constant 0 : index
    %132 = vector.load %arg9[%131, %c0_75, %c0_76] : memref<12x2x128xf32, #tpu.memory_space<vmem>>, vector<1x2x128xf32>
    %133 = vector.shape_cast %132 : vector<1x2x128xf32> to vector<2x128xf32>
    %134 = vector.shape_cast %130 : vector<2x128xf32> to vector<1x2x128xf32>
    tpu.vector_store %arg9[%131, %c0_75, %c0_76], %134 {strides = array<i32>} : memref<12x2x128xf32, #tpu.memory_space<vmem>>, vector<1x2x128xf32>,
    %c12_i32 = arith.constant 12 : i32
    %c0_77 = arith.constant 0 : index
    %c0_78 = arith.constant 0 : index
    %135 = vector.load %arg10[%c0_77, %c0_78] : memref<2x128xf32, #tpu.memory_space<vmem>>, vector<2x128xf32>
    tpu.vector_store %arg10[%c0_77, %c0_78], %130 {strides = array<i32>} : memref<2x128xf32, #tpu.memory_space<vmem>>, vector<2x128xf32>,
    %c0_79 = arith.constant 0 : index
    %c0_80 = arith.constant 0 : index
    %c0_81 = arith.constant 0 : index
    %136 = vector.load %arg9[%c0_79, %c0_80, %c0_81] : memref<12x2x128xf32, #tpu.memory_space<vmem>>, vector<12x2x128xf32>
    %137 = vector.shape_cast %136 : vector<12x2x128xf32> to vector<24x128xf32>
    %cst_82 = arith.constant dense<0.000000e+00> : vector<24x128xf32>
    %138 = tpu.matmul %137, %5, %cst_82 {dimension_numbers = #tpu.dot_dimension_numbers<[1], [0], [0], [1], [0, 0, 1, 1], [], []>} : vector<24x128xf32>, vector<128x128xf32>, vector<24x128xf32> -> vector<24x128xf32>
    %c0_83 = arith.constant 0 : index
    %c0_84 = arith.constant 0 : index
    %139 = vector.load %arg7[%c0_83, %c0_84] : memref<1x128xf32, #tpu.memory_space<vmem>>, vector<1x128xf32>
    %140 = vector.broadcast %139 : vector<1x128xf32> to vector<24x128xf32>
    %141 = arith.addf %138, %140 : vector<24x128xf32>
    %142 = vector.shape_cast %141 : vector<24x128xf32> to vector<12x2x128xf32>
    %c0_85 = arith.constant 0 : index
    %c0_86 = arith.constant 0 : index
    %c0_87 = arith.constant 0 : index
    %143 = vector.load %arg8[%c0_85, %c0_86, %c0_87] : memref<12x2x128xf32, #tpu.memory_space<vmem>>, vector<12x2x128xf32>
    tpu.vector_store %arg8[%c0_85, %c0_86, %c0_87], %142 {strides = array<i32>} : memref<12x2x128xf32, #tpu.memory_space<vmem>>, vector<12x2x128xf32>,
    return
  }
  func.func @transform_0(%arg0: i32, %arg1: i32) -> (i32, i32, i32) {
    %c0_i32 = arith.constant 0 : i32
    %c0_i32_0 = arith.constant 0 : i32
    return %arg1, %arg0, %c0_i32 : i32, i32, i32
  }
  func.func @transform_1(%arg0: i32, %arg1: i32) -> (i32, i32) {
    %c0_i32 = arith.constant 0 : i32
    %c0_i32_0 = arith.constant 0 : i32
    %c0_i32_1 = arith.constant 0 : i32
    return %c0_i32, %c0_i32_0 : i32, i32
  }
  func.func @transform_2(%arg0: i32, %arg1: i32) -> (i32, i32) {
    %c0_i32 = arith.constant 0 : i32
    %c0_i32_0 = arith.constant 0 : i32
    %c0_i32_1 = arith.constant 0 : i32
    return %c0_i32, %c0_i32_0 : i32, i32
  }
  func.func @transform_3(%arg0: i32, %arg1: i32) -> (i32, i32) {
    %c0_i32 = arith.constant 0 : i32
    %c0_i32_0 = arith.constant 0 : i32
    %c0_i32_1 = arith.constant 0 : i32
    return %c0_i32, %c0_i32_0 : i32, i32
  }
  func.func @transform_4(%arg0: i32, %arg1: i32) -> (i32, i32) {
    %c0_i32 = arith.constant 0 : i32
    %c0_i32_0 = arith.constant 0 : i32
    %c0_i32_1 = arith.constant 0 : i32
    return %c0_i32, %c0_i32_0 : i32, i32
  }
  func.func @transform_5(%arg0: i32, %arg1: i32) -> (i32, i32) {
    %c0_i32 = arith.constant 0 : i32
    %c0_i32_0 = arith.constant 0 : i32
    %c0_i32_1 = arith.constant 0 : i32
    return %c0_i32, %c0_i32_0 : i32, i32
  }
  func.func @transform_6(%arg0: i32, %arg1: i32) -> (i32, i32, i32) {
    %c0_i32 = arith.constant 0 : i32
    %c0_i32_0 = arith.constant 0 : i32
    return %arg1, %arg0, %c0_i32 : i32, i32, i32
  }
}

</mosaic_0001>

<bundles_post_ra>
// kernel: tpu_custom_call.1
= control target key start
LH: loop header
LB: loop body
LE: loop exit
PB: predicated region body
PF: predicated region fallthrough
CT: control target
= control target key end

     0   :  { %11 = vsyncpa [#allocation5], 0  ;;  %s1147_s0 = inlined_call_operand.hbm [shape: f32[12,2,16], index: 0, kind: input, shape index: {}]   ;;  %s1148_s1 = inlined_call_operand.hbm [shape: f32[16,128], index: 1, kind: input, shape index: {}]   ;;  %s1149_s2 = inlined_call_operand.hbm [shape: f32[128,128], index: 2, kind: input, shape index: {}]   ;;  %s1150_s3 = inlined_call_operand.hbm [shape: f32[128,128], index: 3, kind: input, shape index: {}]   ;;  %s1151_s4 = inlined_call_operand.vmem [shape: f32[1,128], index: 4, kind: input, shape index: {}]   ;;  %s1152_s5 = inlined_call_operand.vmem [shape: f32[1,128], index: 5, kind: input, shape index: {}]   ;;  %s1153_s6 = inlined_call_operand.hbm [shape: f32[12,2,128], index: 6, kind: output, shape index: {}]  }
   0x1   :  { %12 = vsyncpa [#allocation8], 0 }
   0x2   :  { %13 = vsyncpa [#allocation11], 0  ;;  %s32_s23 = sshll.u32 %s1148_s1, 4  ;;  %s33_s23 = int_to_ptr.hbm [resolvable:$true] %s32_s23 }
   0x3   :  { %14 = vsyncpa [#allocation6], 0  ;;  %s843_s24 = smov [#allocation7]   ;;  %s19_s28 = sshll.u32 %s1147_s0, 4  ;;  %s20_s28 = int_to_ptr.hbm [resolvable:$true] %s19_s28 }
   0x4   :  { %s34_s25 = sshll.u32 %s843_s24, 4  ;;  %s844_s29 = smov 128   ;;  %s35_s25 = int_to_ptr.vmem [resolvable:$true] %s34_s25 }
   0x5   :  { %s845_s30 = smov 8   ;;  %s846_s7 = smov [#allocation4]  }
   0x6   :  { %40 = dma.hbm_to_vmem [thread:$0]  %s33_s23, 256, %s35_s25, [#allocation8], %s844_s29, %s844_s29, %s845_s30  }
   0x7   :  { %s21_s8 = sshll.u32 %s846_s7, 4  ;;  %s847_s9 = smov 32   ;;  %s22_s8 = int_to_ptr.vmem [resolvable:$true] %s21_s8 }
   0x8   :  { %s848_s10 = smov 2   ;;  %s45_s12 = sshll.u32 %s1149_s2, 4  ;;  %s46_s12 = int_to_ptr.hbm [resolvable:$true] %s45_s12 }
   0x9   :  { %27 = dma.hbm_to_vmem [thread:$0]  %s20_s28, 384, %s22_s8, [#allocation5], %s847_s9, %s847_s9, %s848_s10  }
   0xa   :  { %s849_s13 = smov [#allocation9]   ;;  %s58_s16 = sshll.u32 %s1150_s3, 4  ;;  %s59_s16 = int_to_ptr.hbm [resolvable:$true] %s58_s16 }
   0xb   :  { %s47_s0 = sshll.u32 %s849_s13, 4  ;;  %s850_s17 = smov [#allocation10]   ;;  %s48_s0 = int_to_ptr.vmem [resolvable:$true] %s47_s0 }
   0xc   :  { %53 = dma.hbm_to_vmem [thread:$0]  %s46_s12, 2048, %s48_s0, [#allocation8], %s844_s29, %s844_s29, %s845_s30  }
   0xd   :  { %s60_s18 = sshll.u32 %s850_s17, 4  ;;  %s61_s18 = int_to_ptr.vmem [resolvable:$true] %s60_s18 }
   0xe   :  { %66 = dma.hbm_to_vmem [thread:$0]  %s59_s16, 2048, %s61_s18, [#allocation11], %s844_s29, %s844_s29, %s845_s30  }
   0xf   :  { %835 = dma.done.wait [#allocation5], 384  }
  0x10   :  { %836 = vsyncadd [#allocation5], 4294966912 }
  0x11   :  { %837 = dma.done.wait [#allocation8], 2304  }
  0x12   :  { %838 = vsyncadd [#allocation8], 4294964992 }
  0x13   :  { %839 = dma.done.wait [#allocation11], 2048  }
  0x14   :  { %840 = vsyncadd [#allocation11], 4294965248  ;;  %v851_v0 = vmov 0.0   ;;  %v903_v1 = vld [vmem:[#allocation9 + $0x78] sm:$0xff]  ;;  %v905_v2 = vld [vmem:[#allocation9 + $0x70] sm:$0xff]  ;;  %vm176_vm0 = vcmask 130048  }
  0x15   :  { %91 = vst [vmem:[#allocation3] sm:$0x3] %v851_v0  ;;  %244 = vmatpush.msra.mxu2 %v903_v1  ;;  %294 = vmatpush.msra.mxu3 %v903_v1  ;;  %v909_v3 = vld [vmem:[#allocation9 + $0x68] sm:$0xff]  ;;  %v914_v4 = vld [vmem:[#allocation9 + $0x60] sm:$0xff]  ;;  %v93_v5 = vld [vmem:[#allocation7 + $0x8] sm:$0xff]  ;;  %s661_s23 = sshll.u32 %s1153_s6, 4  ;;  %s662_s23 = int_to_ptr.hbm [resolvable:$true] %s661_s23 }
  0x16   :  { %344 = vmatpush.msra.mxu1 %v903_v1  ;;  %v92_v6 = vld [vmem:[#allocation7] sm:$0xff]  ;;  %v918_v7 = vld [vmem:[#allocation9 + $0x58] sm:$0xff]  ;;  %197 = vmatpush.msra.mxu0 %v93_v5  ;;  %v929_v13 = vld [vmem:[#allocation9 + $0x48] sm:$0xff] }
  0x17   :  { %245 = vmatpush.msra.mxu2 %v905_v2  ;;  %295 = vmatpush.msra.mxu3 %v905_v2  ;;  %v126_v8 = vld [vmem:[#allocation4] sm:$0x3]  ;;  %v127_v9 = vld [vmem:[#allocation4 + $0x2] sm:$0x3]  ;;  %v128_v10 = vld [vmem:[#allocation4 + $0x4] sm:$0x3] }
  0x18   :  { %345 = vmatpush.msra.mxu1 %v905_v2  ;;  %v129_v11 = vld [vmem:[#allocation4 + $0x6] sm:$0x3]  ;;  %154 = vst [vmem:[#allocation1] ss:$4 sm:$0xff] %v126_v8  ;;  %v923_v12 = vld [vmem:[#allocation9 + $0x50] sm:$0xff]  ;;  %198 = vmatpush.msra.mxu0 %v92_v6  ;;  %v935_v14 = vld [vmem:[#allocation9 + $0x40] sm:$0xff] }
  0x19   :  { %246 = vmatpush.msra.mxu2 %v909_v3  ;;  %296 = vmatpush.msra.mxu3 %v909_v3  ;;  %156 = vst [vmem:[#allocation1 + $0x1] ss:$4 sm:$0xff] %v127_v9  ;;  %v941_v15 = vld [vmem:[#allocation9 + $0x38] sm:$0xff]  ;;  %v947_v16 = vld [vmem:[#allocation9 + $0x30] sm:$0xff]  ;;  %v953_v18 = vld [vmem:[#allocation9 + $0x28] sm:$0xff] }
  0x1a   :  { %346 = vmatpush.msra.mxu1 %v909_v3  ;;  %158 = vst [vmem:[#allocation1 + $0x2] ss:$4 sm:$0xff] %v128_v10  ;;  %319 = vmatpush.msrb.mxu0 %v903_v1  ;;  %v959_v19 = vld [vmem:[#allocation9 + $0x20] sm:$0xff]  ;;  %v965_v20 = vld [vmem:[#allocation9 + $0x18] sm:$0xff]  ;;  %v971_v21 = vld [vmem:[#allocation9 + $0x10] sm:$0xff] }
  0x1b   :  { %247 = vmatpush.msra.mxu2 %v914_v4  ;;  %297 = vmatpush.msra.mxu3 %v914_v4  ;;  %160 = vst [vmem:[#allocation1 + $0x3] ss:$4 sm:$0xff] %v129_v11  ;;  %v977_v22 = vld [vmem:[#allocation9 + $0x8] sm:$0xff]  ;;  %v983_v23 = vld [vmem:[#allocation9] sm:$0xff]  ;;  %v1083_v25 = vld [vmem:[%s1151_s4] ss:$0 sm:$0xff] }
  0x1c   :  { %347 = vmatpush.msra.mxu1 %v914_v4  ;;  %320 = vmatpush.msrb.mxu0 %v905_v2  ;;  %v242_v24 = vld [vmem:[#allocation3] sm:$0x3]  ;;  %v134_v26 = vld [vmem:[#allocation4 + $0x10] sm:$0x3]  ;;  %v135_v27 = vld [vmem:[#allocation4 + $0x12] sm:$0x3] }
  0x1d   :  { %248 = vmatpush.msra.mxu2 %v918_v7  ;;  %298 = vmatpush.msra.mxu3 %v918_v7  ;;  %v136_v28 = vld [vmem:[#allocation4 + $0x14] sm:$0x3]  ;;  %v137_v29 = vld [vmem:[#allocation4 + $0x16] sm:$0x3]  ;;  %v130_v41 = vld [vmem:[#allocation4 + $0x8] sm:$0x3] }
  0x1e   :  { %348 = vmatpush.msra.mxu1 %v918_v7  ;;  %321 = vmatpush.msrb.mxu0 %v909_v3  ;;  %v131_v42 = vld [vmem:[#allocation4 + $0xa] sm:$0x3]  ;;  %v132_v43 = vld [vmem:[#allocation4 + $0xc] sm:$0x3]  ;;  %v133_v44 = vld [vmem:[#allocation4 + $0xe] sm:$0x3] }
  0x1f   :  { %249 = vmatpush.msra.mxu2 %v923_v12  ;;  %299 = vmatpush.msra.mxu3 %v923_v12  ;;  %162 = vst [vmem:[#allocation1 + $0x20] ss:$4 sm:$0xff] %v130_v41 }
  0x20   :  { %349 = vmatpush.msra.mxu1 %v923_v12  ;;  %322 = vmatpush.msrb.mxu0 %v914_v4  ;;  %164 = vst [vmem:[#allocation1 + $0x21] ss:$4 sm:$0xff] %v131_v42 }
  0x21   :  { %250 = vmatpush.msra.mxu2 %v929_v13  ;;  %300 = vmatpush.msra.mxu3 %v929_v13  ;;  %166 = vst [vmem:[#allocation1 + $0x22] ss:$4 sm:$0xff] %v132_v43 }
  0x22   :  { %350 = vmatpush.msra.mxu1 %v929_v13  ;;  %v169_v17 = vld.sshfl [vmem:[#allocation1] sm:$0xff pattern:$0x73625140]  ;;  %323 = vmatpush.msrb.mxu0 %v918_v7  ;;  %168 = vst [vmem:[#allocation1 + $0x23] ss:$4 sm:$0xff] %v133_v44 }
  0x23   :  { %251 = vmatpush.msra.mxu2 %v935_v14  ;;  %301 = vmatpush.msra.mxu3 %v935_v14  ;;  %171 = vst [vmem:[#allocation1] ss:$4 sm:$0xff] %v134_v26 }
  0x24   :  { %676 = vmatmul.msk.f32.vlgmr.msra.gmra.mxu0 %vm176_vm0, %v169_v17  ;;  %351 = vmatpush.msra.mxu1 %v935_v14  ;;  %172 = vst [vmem:[#allocation1 + $0x1] ss:$4 sm:$0xff] %v135_v27  ;;  %v125_v17 = vld [vmem:[#allocation10 + $0x78] sm:$0xff] }
  0x25   :  { %252 = vmatpush.msra.mxu2 %v941_v15  ;;  %302 = vmatpush.msra.mxu3 %v941_v15  ;;  %173 = vst [vmem:[#allocation1 + $0x2] ss:$4 sm:$0xff] %v136_v28 }
  0x26   :  { %324 = vmatpush.msrb.mxu0 %v923_v12  ;;  %352 = vmatpush.msra.mxu1 %v941_v15  ;;  %174 = vst [vmem:[#allocation1 + $0x3] ss:$4 sm:$0xff] %v137_v29  ;;  %v118_v29 = vld [vmem:[#allocation10 + $0x40] sm:$0xff] }
  0x27   :  { %253 = vmatpush.msra.mxu2 %v947_v16  ;;  %303 = vmatpush.msra.mxu3 %v947_v16 }
  0x28   :  { %325 = vmatpush.msrb.mxu0 %v929_v13  ;;  %353 = vmatpush.msra.mxu1 %v947_v16 }
  0x29   :  { %254 = vmatpush.msra.mxu2 %v953_v18  ;;  %304 = vmatpush.msra.mxu3 %v953_v18  ;;  %v170_v45 = vld.sshfl [vmem:[#allocation1 + $0x20] sm:$0xff pattern:$0x73625140] }
  0x2a   :  { %326 = vmatpush.msrb.mxu0 %v935_v14  ;;  %354 = vmatpush.msra.mxu1 %v953_v18 }
  0x2b   :  { %255 = vmatpush.msra.mxu2 %v959_v19  ;;  %305 = vmatpush.msra.mxu3 %v959_v19 }
  0x2c   :  { %327 = vmatpush.msrb.mxu0 %v941_v15  ;;  %355 = vmatpush.msra.mxu1 %v959_v19 }
  0x2d   :  { %256 = vmatpush.msra.mxu2 %v965_v20  ;;  %306 = vmatpush.msra.mxu3 %v965_v20  ;;  %v175_v39 = vld.sshfl [vmem:[#allocation1] sm:$0xff pattern:$0x73625140] }
  0x2e   :  { %328 = vmatpush.msrb.mxu0 %v947_v16  ;;  %356 = vmatpush.msra.mxu1 %v965_v20 }
  0x2f   :  { %257 = vmatpush.msra.mxu2 %v971_v21  ;;  %307 = vmatpush.msra.mxu3 %v971_v21 }
  0x30   :  { %329 = vmatpush.msrb.mxu0 %v953_v18  ;;  %357 = vmatpush.msra.mxu1 %v971_v21 }
  0x31   :  { %258 = vmatpush.msra.mxu2 %v977_v22  ;;  %308 = vmatpush.msra.mxu3 %v977_v22 }
  0x32   :  { %330 = vmatpush.msrb.mxu0 %v959_v19  ;;  %358 = vmatpush.msra.mxu1 %v977_v22 }
  0x33   :  { %259 = vmatpush.msra.mxu2 %v983_v23  ;;  %309 = vmatpush.msra.mxu3 %v983_v23 }
  0x34   :  { %260 = vmatmul.f32.vlgmr.msra.gmra.mxu2 %v242_v24  ;;  %331 = vmatpush.msrb.mxu0 %v965_v20 }
  0x35   :  { %269 = vmatpush.msrb.mxu2 %v903_v1  ;;  %394 = vmatpush.msrb.mxu3 %v903_v1 }
  0x36   :  { %332 = vmatpush.msrb.mxu0 %v971_v21  ;;  %359 = vmatpush.msra.mxu1 %v983_v23 }
  0x37   :  { %270 = vmatpush.msrb.mxu2 %v905_v2  ;;  %395 = vmatpush.msrb.mxu3 %v905_v2 }
  0x38   :  { %333 = vmatpush.msrb.mxu0 %v977_v22  ;;  %444 = vmatpush.msrb.mxu1 %v903_v1 }
  0x39   :  { %271 = vmatpush.msrb.mxu2 %v909_v3  ;;  %396 = vmatpush.msrb.mxu3 %v909_v3 }
  0x3a   :  { %334 = vmatpush.msrb.mxu0 %v983_v23  ;;  %445 = vmatpush.msrb.mxu1 %v905_v2 }
  0x3b   :  { %272 = vmatpush.msrb.mxu2 %v914_v4  ;;  %397 = vmatpush.msrb.mxu3 %v914_v4 }
  0x3c   :  { %419 = vmatpush.msra.mxu0 %v903_v1  ;;  %446 = vmatpush.msrb.mxu1 %v909_v3 }
  0x3d   :  { %273 = vmatpush.msrb.mxu2 %v918_v7  ;;  %398 = vmatpush.msrb.mxu3 %v918_v7 }
  0x3e   :  { %420 = vmatpush.msra.mxu0 %v905_v2  ;;  %447 = vmatpush.msrb.mxu1 %v914_v4 }
  0x3f   :  { %274 = vmatpush.msrb.mxu2 %v923_v12  ;;  %399 = vmatpush.msrb.mxu3 %v923_v12 }
  0x40   :  { %421 = vmatpush.msra.mxu0 %v909_v3  ;;  %448 = vmatpush.msrb.mxu1 %v918_v7 }
  0x41   :  { %275 = vmatpush.msrb.mxu2 %v929_v13  ;;  %400 = vmatpush.msrb.mxu3 %v929_v13 }
  0x42   :  { %422 = vmatpush.msra.mxu0 %v914_v4  ;;  %449 = vmatpush.msrb.mxu1 %v923_v12 }
  0x43   :  { %276 = vmatpush.msrb.mxu2 %v935_v14  ;;  %401 = vmatpush.msrb.mxu3 %v935_v14 }
  0x44   :  { %423 = vmatpush.msra.mxu0 %v918_v7  ;;  %450 = vmatpush.msrb.mxu1 %v929_v13 }
  0x45   :  { %277 = vmatpush.msrb.mxu2 %v941_v15  ;;  %402 = vmatpush.msrb.mxu3 %v941_v15 }
  0x46   :  { %424 = vmatpush.msra.mxu0 %v923_v12  ;;  %451 = vmatpush.msrb.mxu1 %v935_v14 }
  0x47   :  { %278 = vmatpush.msrb.mxu2 %v947_v16  ;;  %403 = vmatpush.msrb.mxu3 %v947_v16 }
  0x48   :  { %425 = vmatpush.msra.mxu0 %v929_v13  ;;  %452 = vmatpush.msrb.mxu1 %v941_v15 }
  0x49   :  { %279 = vmatpush.msrb.mxu2 %v953_v18  ;;  %404 = vmatpush.msrb.mxu3 %v953_v18 }
  0x4a   :  { %426 = vmatpush.msra.mxu0 %v935_v14  ;;  %453 = vmatpush.msrb.mxu1 %v947_v16 }
  0x4b   :  { %280 = vmatpush.msrb.mxu2 %v959_v19  ;;  %405 = vmatpush.msrb.mxu3 %v959_v19 }
  0x4c   :  { %427 = vmatpush.msra.mxu0 %v941_v15  ;;  %454 = vmatpush.msrb.mxu1 %v953_v18 }
  0x4d   :  { %281 = vmatpush.msrb.mxu2 %v965_v20  ;;  %406 = vmatpush.msrb.mxu3 %v965_v20 }
  0x4e   :  { %428 = vmatpush.msra.mxu0 %v947_v16  ;;  %455 = vmatpush.msrb.mxu1 %v959_v19 }
  0x4f   :  { %282 = vmatpush.msrb.mxu2 %v971_v21  ;;  %407 = vmatpush.msrb.mxu3 %v971_v21 }
  0x50   :  { %429 = vmatpush.msra.mxu0 %v953_v18  ;;  %456 = vmatpush.msrb.mxu1 %v965_v20 }
  0x51   :  { %283 = vmatpush.msrb.mxu2 %v977_v22  ;;  %408 = vmatpush.msrb.mxu3 %v977_v22 }
  0x52   :  { %430 = vmatpush.msra.mxu0 %v959_v19  ;;  %457 = vmatpush.msrb.mxu1 %v971_v21 }
  0x53   :  { %284 = vmatpush.msrb.mxu2 %v983_v23  ;;  %409 = vmatpush.msrb.mxu3 %v983_v23 }
  0x54   :  { %431 = vmatpush.msra.mxu0 %v965_v20  ;;  %458 = vmatpush.msrb.mxu1 %v977_v22 }
  0x55   :  { %369 = vmatpush.msra.mxu2 %v903_v1  ;;  %677 = vmatmul.msk.f32.gmra.mxu0 %vm176_vm0, %v170_v45 }
  0x56   :  { %432 = vmatpush.msra.mxu0 %v971_v21  ;;  %459 = vmatpush.msrb.mxu1 %v983_v23 }
  0x57   :  { %370 = vmatpush.msra.mxu2 %v905_v2 }
  0x58   :  { %433 = vmatpush.msra.mxu0 %v977_v22 }
  0x59   :  { %371 = vmatpush.msra.mxu2 %v909_v3 }
  0x5a   :  { %434 = vmatpush.msra.mxu0 %v983_v23 }
  0x5b   :  { %372 = vmatpush.msra.mxu2 %v914_v4 }
  0x5d   :  { %373 = vmatpush.msra.mxu2 %v918_v7  ;;  %678 = vmatmul.msk.f32.gmra.mxu0 %vm176_vm0, %v175_v39 }
  0x5f   :  { %374 = vmatpush.msra.mxu2 %v923_v12 }
  0x61   :  { %375 = vmatpush.msra.mxu2 %v929_v13 }
  0x63   :  { %376 = vmatpush.msra.mxu2 %v935_v14 }
  0x65   :  { %377 = vmatpush.msra.mxu2 %v941_v15 }
  0x67   :  { %378 = vmatpush.msra.mxu2 %v947_v16 }
  0x69   :  { %379 = vmatpush.msra.mxu2 %v953_v18 }
  0x6b   :  { %380 = vmatpush.msra.mxu2 %v959_v19 }
  0x6d   :  { %381 = vmatpush.msra.mxu2 %v965_v20 }
  0x6f   :  { %382 = vmatpush.msra.mxu2 %v971_v21 }
  0x71   :  { %383 = vmatpush.msra.mxu2 %v977_v22 }
  0x73   :  { %384 = vmatpush.msra.mxu2 %v983_v23 }
  0xa1   :  { %v200_v30 = vpop.f32.mrf.mxu0 }
  0xa2   :  { %v201_v31 = vadd.f32 %v1083_v25, %v200_v30  ;;  %v117_v30 = vld [vmem:[#allocation10 + $0x38] sm:$0xff] }
  0xa4   :  { %v212_v32 = vrot.slane %v201_v31, 2  ;;  %v213_v33 = vrot.slane %v201_v31, 4  ;;  %v214_v34 = vrot.slane %v201_v31, 6  ;;  %230 = vst [vmem:[#allocation2] sm:$0x3] %v201_v31  ;;  %v116_v31 = vld [vmem:[#allocation10 + $0x30] sm:$0xff] }
  0xa6   :  { %231 = vst [vmem:[#allocation2 + $0x2] sm:$0x3] %v212_v32  ;;  %v115_v32 = vld [vmem:[#allocation10 + $0x28] sm:$0xff] }
  0xa7   :  { %232 = vst [vmem:[#allocation2 + $0x4] sm:$0x3] %v213_v33  ;;  %v114_v33 = vld [vmem:[#allocation10 + $0x20] sm:$0xff] }
  0xa8   :  { %233 = vst [vmem:[#allocation2 + $0x6] sm:$0x3] %v214_v34  ;;  %v113_v34 = vld [vmem:[#allocation10 + $0x18] sm:$0xff] }
  0xab   :  { %v243_v35 = vld [vmem:[#allocation2] sm:$0x3] }
  0xad   :  { %v268_v46 = vld [vmem:[#allocation2 + $0x2] sm:$0x3] }
  0xae   :  { %v293_v61 = vld [vmem:[#allocation2 + $0x4] sm:$0x3] }
  0xb7   :  { %v261_v36 = vpop.f32.mrf.mxu2 }
  0xb8   :  { %v264_v37 = vadd.f32 %v261_v36, %v243_v35  ;;  %v112_v35 = vld [vmem:[#allocation10 + $0x10] sm:$0xff]  ;;  %v111_v36 = vld [vmem:[#allocation10 + $0x8] sm:$0xff] }
  0xba   :  { %691 = vtanh.f32 %v264_v37  ;;  %v110_v37 = vld [vmem:[#allocation10] sm:$0xff] }
  0xc0   :  { %v692_v38 = vpop.eup %691 }
  0xc1   :  { %266 = vst [vmem:[#allocation2] sm:$0x3] %v692_v38  ;;  %285 = vmatmul.f32.vlgmr.msrb.gmra.mxu2 %v692_v38 }
  0xc2   :  { %469 = vmatpush.msrb.mxu2 %v903_v1 }
  0xc4   :  { %470 = vmatpush.msrb.mxu2 %v905_v2 }
  0xc6   :  { %471 = vmatpush.msrb.mxu2 %v909_v3 }
  0xc8   :  { %v543_v40 = vld [vmem:[#allocation2] sm:$0x3]  ;;  %472 = vmatpush.msrb.mxu2 %v914_v4 }
  0xc9   :  { %571 = vst [vmem:[#allocation1] ss:$4 sm:$0xff] %v543_v40 }
  0xca   :  { %473 = vmatpush.msrb.mxu2 %v918_v7 }
  0xcc   :  { %474 = vmatpush.msrb.mxu2 %v923_v12 }
  0xce   :  { %475 = vmatpush.msrb.mxu2 %v929_v13 }
  0xd0   :  { %476 = vmatpush.msrb.mxu2 %v935_v14 }
  0xd2   :  { %477 = vmatpush.msrb.mxu2 %v941_v15  ;;  %v203_v51 = vpop.f32.mrf.mxu0 }
  0xd3   :  { %v204_v52 = vadd.f32 %v1083_v25, %v203_v51 }
  0xd4   :  { %478 = vmatpush.msrb.mxu2 %v947_v16 }
  0xd5   :  { %v215_v53 = vrot.slane %v204_v52, 2  ;;  %v216_v54 = vrot.slane %v204_v52, 4  ;;  %v217_v55 = vrot.slane %v204_v52, 6  ;;  %234 = vst [vmem:[#allocation2 + $0x8] sm:$0x3] %v204_v52 }
  0xd6   :  { %479 = vmatpush.msrb.mxu2 %v953_v18 }
  0xd7   :  { %235 = vst [vmem:[#allocation2 + $0xa] sm:$0x3] %v215_v53 }
  0xd8   :  { %480 = vmatpush.msrb.mxu2 %v959_v19  ;;  %236 = vst [vmem:[#allocation2 + $0xc] sm:$0x3] %v216_v54 }
  0xd9   :  { %237 = vst [vmem:[#allocation2 + $0xe] sm:$0x3] %v217_v55 }
  0xda   :  { %481 = vmatpush.msrb.mxu2 %v965_v20  ;;  %v206_v56 = vpop.f32.mrf.mxu0 }
  0xdb   :  { %v207_v57 = vadd.f32 %v1083_v25, %v206_v56 }
  0xdc   :  { %482 = vmatpush.msrb.mxu2 %v971_v21 }
  0xdd   :  { %v218_v58 = vrot.slane %v207_v57, 2  ;;  %v219_v59 = vrot.slane %v207_v57, 4  ;;  %v220_v60 = vrot.slane %v207_v57, 6  ;;  %238 = vst [vmem:[#allocation2 + $0x10] sm:$0x3] %v207_v57 }
  0xde   :  { %483 = vmatpush.msrb.mxu2 %v977_v22 }
  0xdf   :  { %239 = vst [vmem:[#allocation2 + $0x12] sm:$0x3] %v218_v58  ;;  %v393_v24 = vld [vmem:[#allocation2 + $0xc] sm:$0x3] }
  0xe0   :  { %484 = vmatpush.msrb.mxu2 %v983_v23  ;;  %240 = vst [vmem:[#allocation2 + $0x14] sm:$0x3] %v219_v59  ;;  %v418_v38 = vld [vmem:[#allocation2 + $0xe] sm:$0x3] }
  0xe1   :  { %241 = vst [vmem:[#allocation2 + $0x16] sm:$0x3] %v220_v60 }
  0xe4   :  { %v443_v45 = vld [vmem:[#allocation2 + $0x10] sm:$0x3] }
 0x144   :  { %v286_v47 = vpop.f32.mrf.mxu2 }
 0x145   :  { %v289_v48 = vadd.f32 %v286_v47, %v268_v46 }
 0x147   :  { %693 = vtanh.f32 %v289_v48  ;;  %v690_v48 = vld [vmem:[%s1152_s5] ss:$0 sm:$0xff]  ;;  %s852_s5 = smov [#allocation12]  }
 0x148   :  { %s659_s20 = sshll.u32 %s852_s5, 4  ;;  %s660_s20 = int_to_ptr.vmem [resolvable:$true] %s659_s20 }
 0x14d   :  { %v694_v49 = vpop.eup %693 }
 0x14e   :  { %291 = vst [vmem:[#allocation2 + $0x2] sm:$0x3] %v694_v49  ;;  %310 = vmatmul.f32.vlgmr.msra.gmra.mxu3 %v694_v49 }
 0x14f   :  { %494 = vmatpush.msra.mxu3 %v903_v1 }
 0x151   :  { %495 = vmatpush.msra.mxu3 %v905_v2 }
 0x153   :  { %496 = vmatpush.msra.mxu3 %v909_v3 }
 0x155   :  { %v544_v50 = vld [vmem:[#allocation2 + $0x2] sm:$0x3]  ;;  %497 = vmatpush.msra.mxu3 %v914_v4 }
 0x156   :  { %573 = vst [vmem:[#allocation1 + $0x1] ss:$4 sm:$0xff] %v544_v50 }
 0x157   :  { %498 = vmatpush.msra.mxu3 %v918_v7 }
 0x159   :  { %499 = vmatpush.msra.mxu3 %v923_v12 }
 0x15b   :  { %500 = vmatpush.msra.mxu3 %v929_v13 }
 0x15d   :  { %501 = vmatpush.msra.mxu3 %v935_v14 }
 0x15f   :  { %502 = vmatpush.msra.mxu3 %v941_v15 }
 0x161   :  { %503 = vmatpush.msra.mxu3 %v947_v16 }
 0x163   :  { %504 = vmatpush.msra.mxu3 %v953_v18 }
 0x165   :  { %505 = vmatpush.msra.mxu3 %v959_v19 }
 0x167   :  { %506 = vmatpush.msra.mxu3 %v965_v20 }
 0x169   :  { %507 = vmatpush.msra.mxu3 %v971_v21 }
 0x16b   :  { %508 = vmatpush.msra.mxu3 %v977_v22 }
 0x16d   :  { %509 = vmatpush.msra.mxu3 %v983_v23 }
 0x1d1   :  { %v311_v62 = vpop.f32.mrf.mxu3 }
 0x1d2   :  { %v314_v63 = vadd.f32 %v311_v62, %v293_v61  ;;  %v468_v61 = vld [vmem:[#allocation2 + $0x12] sm:$0x3] }
 0x1d4   :  { %695 = vtanh.f32 %v314_v63 }
 0x1da   :  { %v696_v0 = vpop.eup %695 }
 0x1db   :  { %316 = vst [vmem:[#allocation2 + $0x4] sm:$0x3] %v696_v0  ;;  %335 = vmatmul.f32.vlgmr.msrb.gmra.mxu0 %v696_v0 }
 0x1dc   :  { %519 = vmatpush.msrb.mxu0 %v903_v1  ;;  %v318_v1 = vld [vmem:[#allocation2 + $0x6] sm:$0x3] }
 0x1de   :  { %520 = vmatpush.msrb.mxu0 %v905_v2 }
 0x1e0   :  { %521 = vmatpush.msrb.mxu0 %v909_v3 }
 0x1e2   :  { %v545_v5 = vld [vmem:[#allocation2 + $0x4] sm:$0x3]  ;;  %522 = vmatpush.msrb.mxu0 %v914_v4 }
 0x1e3   :  { %575 = vst [vmem:[#allocation1 + $0x2] ss:$4 sm:$0xff] %v545_v5 }
 0x1e4   :  { %523 = vmatpush.msrb.mxu0 %v918_v7  ;;  %v343_v7 = vld [vmem:[#allocation2 + $0x8] sm:$0x3] }
 0x1e6   :  { %524 = vmatpush.msrb.mxu0 %v923_v12  ;;  %v368_v12 = vld [vmem:[#allocation2 + $0xa] sm:$0x3] }
 0x1e8   :  { %525 = vmatpush.msrb.mxu0 %v929_v13 }
 0x1ea   :  { %526 = vmatpush.msrb.mxu0 %v935_v14 }
 0x1ec   :  { %527 = vmatpush.msrb.mxu0 %v941_v15 }
 0x1ee   :  { %528 = vmatpush.msrb.mxu0 %v947_v16 }
 0x1f0   :  { %529 = vmatpush.msrb.mxu0 %v953_v18  ;;  %v124_v18 = vld [vmem:[#allocation10 + $0x70] sm:$0xff] }
 0x1f2   :  { %530 = vmatpush.msrb.mxu0 %v959_v19  ;;  %v123_v19 = vld [vmem:[#allocation10 + $0x68] sm:$0xff] }
 0x1f4   :  { %531 = vmatpush.msrb.mxu0 %v965_v20  ;;  %v122_v20 = vld [vmem:[#allocation10 + $0x60] sm:$0xff] }
 0x1f6   :  { %532 = vmatpush.msrb.mxu0 %v971_v21  ;;  %v121_v21 = vld [vmem:[#allocation10 + $0x58] sm:$0xff] }
 0x1f8   :  { %533 = vmatpush.msrb.mxu0 %v977_v22  ;;  %v120_v22 = vld [vmem:[#allocation10 + $0x50] sm:$0xff] }
 0x1fa   :  { %534 = vmatpush.msrb.mxu0 %v983_v23  ;;  %v119_v23 = vld [vmem:[#allocation10 + $0x48] sm:$0xff] }
 0x258   :  { %v336_v2 = vpop.f32.mrf.mxu0 }
 0x259   :  { %v339_v3 = vadd.f32 %v336_v2, %v318_v1  ;;  %v493_v1 = vld [vmem:[#allocation2 + $0x14] sm:$0x3] }
 0x25b   :  { %697 = vtanh.f32 %v339_v3 }
 0x261   :  { %v698_v4 = vpop.eup %697 }
 0x262   :  { %341 = vst [vmem:[#allocation2 + $0x6] sm:$0x3] %v698_v4  ;;  %360 = vmatmul.f32.vlgmr.msra.gmra.mxu1 %v698_v4 }
 0x263   :  { %596 = vmatpush.msra.mxu1 %v125_v17 }
 0x265   :  { %597 = vmatpush.msra.mxu1 %v124_v18 }
 0x267   :  { %598 = vmatpush.msra.mxu1 %v123_v19 }
 0x269   :  { %v546_v6 = vld [vmem:[#allocation2 + $0x6] sm:$0x3]  ;;  %599 = vmatpush.msra.mxu1 %v122_v20 }
 0x26a   :  { %577 = vst [vmem:[#allocation1 + $0x3] ss:$4 sm:$0xff] %v546_v6 }
 0x26b   :  { %600 = vmatpush.msra.mxu1 %v121_v21 }
 0x26d   :  { %601 = vmatpush.msra.mxu1 %v120_v22 }
 0x26f   :  { %602 = vmatpush.msra.mxu1 %v119_v23 }
 0x271   :  { %603 = vmatpush.msra.mxu1 %v118_v29  ;;  %v586_v42 = vld.sshfl [vmem:[#allocation1] sm:$0xff pattern:$0x73625140] }
 0x273   :  { %604 = vmatpush.msra.mxu1 %v117_v30 }
 0x275   :  { %605 = vmatpush.msra.mxu1 %v116_v31 }
 0x277   :  { %606 = vmatpush.msra.mxu1 %v115_v32 }
 0x279   :  { %607 = vmatpush.msra.mxu1 %v114_v33 }
 0x27b   :  { %608 = vmatpush.msra.mxu1 %v113_v34 }
 0x27d   :  { %609 = vmatpush.msra.mxu1 %v112_v35 }
 0x27f   :  { %610 = vmatpush.msra.mxu1 %v111_v36 }
 0x281   :  { %611 = vmatpush.msra.mxu1 %v110_v37 }
 0x2df   :  { %v361_v8 = vpop.f32.mrf.mxu1 }
 0x2e0   :  { %v364_v9 = vadd.f32 %v361_v8, %v343_v7  ;;  %v518_v7 = vld [vmem:[#allocation2 + $0x16] sm:$0x3] }
 0x2e2   :  { %699 = vtanh.f32 %v364_v9 }
 0x2e8   :  { %v700_v10 = vpop.eup %699 }
 0x2e9   :  { %366 = vst [vmem:[#allocation2 + $0x8] sm:$0x3] %v700_v10  ;;  %385 = vmatmul.f32.vlgmr.msra.gmra.mxu2 %v700_v10 }
 0x2f0   :  { %v547_v11 = vld [vmem:[#allocation2 + $0x8] sm:$0x3] }
 0x2f1   :  { %579 = vst [vmem:[#allocation1 + $0x20] ss:$4 sm:$0xff] %v547_v11 }
 0x36c   :  { %v386_v13 = vpop.f32.mrf.mxu2 }
 0x36d   :  { %v389_v14 = vadd.f32 %v386_v13, %v368_v12 }
 0x36f   :  { %701 = vtanh.f32 %v389_v14 }
 0x375   :  { %v702_v15 = vpop.eup %701 }
 0x376   :  { %391 = vst [vmem:[#allocation2 + $0xa] sm:$0x3] %v702_v15  ;;  %410 = vmatmul.f32.vlgmr.msrb.gmra.mxu3 %v702_v15 }
 0x37d   :  { %v548_v16 = vld [vmem:[#allocation2 + $0xa] sm:$0x3] }
 0x37e   :  { %581 = vst [vmem:[#allocation1 + $0x21] ss:$4 sm:$0xff] %v548_v16 }
 0x3f9   :  { %v411_v25 = vpop.f32.mrf.mxu3 }
 0x3fa   :  { %v414_v26 = vadd.f32 %v411_v25, %v393_v24 }
 0x3fc   :  { %703 = vtanh.f32 %v414_v26 }
 0x402   :  { %v704_v27 = vpop.eup %703 }
 0x403   :  { %416 = vst [vmem:[#allocation2 + $0xc] sm:$0x3] %v704_v27  ;;  %435 = vmatmul.f32.vlgmr.msra.gmra.mxu0 %v704_v27 }
 0x40a   :  { %v549_v28 = vld [vmem:[#allocation2 + $0xc] sm:$0x3] }
 0x40b   :  { %583 = vst [vmem:[#allocation1 + $0x22] ss:$4 sm:$0xff] %v549_v28 }
 0x480   :  { %v436_v39 = vpop.f32.mrf.mxu0 }
 0x481   :  { %v439_v40 = vadd.f32 %v436_v39, %v418_v38 }
 0x483   :  { %705 = vtanh.f32 %v439_v40 }
 0x489   :  { %v706_v41 = vpop.eup %705 }
 0x48a   :  { %441 = vst [vmem:[#allocation2 + $0xe] sm:$0x3] %v706_v41  ;;  %460 = vmatmul.f32.vlgmr.msrb.gmra.mxu1 %v706_v41 }
 0x491   :  { %v550_v43 = vld [vmem:[#allocation2 + $0xe] sm:$0x3] }
 0x492   :  { %612 = vmatmul.f32.vlgmr.msra.gmra.mxu1 %v586_v42  ;;  %585 = vst [vmem:[#allocation1 + $0x23] ss:$4 sm:$0xff] %v550_v43 }
 0x499   :  { %v587_v44 = vld.sshfl [vmem:[#allocation1 + $0x20] sm:$0xff pattern:$0x73625140] }
 0x49a   :  { %615 = vmatmul.f32.gmra.mxu1 %v587_v44 }
 0x507   :  { %v461_v46 = vpop.f32.mrf.mxu1 }
 0x508   :  { %v464_v47 = vadd.f32 %v461_v46, %v443_v45 }
 0x50a   :  { %707 = vtanh.f32 %v464_v47 }
 0x50f   :  { %v613_v49 = vpop.f32.mrf.mxu1 }
 0x510   :  { %v708_v50 = vpop.eup %707  ;;  %v614_v51 = vadd.f32 %v690_v48, %v613_v49 }
 0x511   :  { %466 = vst [vmem:[#allocation2 + $0x10] sm:$0x3] %v708_v50  ;;  %485 = vmatmul.f32.vlgmr.msrb.gmra.mxu2 %v708_v50 }
 0x512   :  { %v625_v52 = vrot.slane %v614_v51, 2  ;;  %v626_v53 = vrot.slane %v614_v51, 4  ;;  %v627_v54 = vrot.slane %v614_v51, 6  ;;  %643 = vst [vmem:[#allocation12] sm:$0x3] %v614_v51 }
 0x514   :  { %644 = vst [vmem:[#allocation12 + $0x2] sm:$0x3] %v625_v52 }
 0x515   :  { %645 = vst [vmem:[#allocation12 + $0x4] sm:$0x3] %v626_v53 }
 0x516   :  { %646 = vst [vmem:[#allocation12 + $0x6] sm:$0x3] %v627_v54 }
 0x517   :  { %v616_v55 = vpop.f32.mrf.mxu1 }
 0x518   :  { %v551_v56 = vld [vmem:[#allocation2 + $0x10] sm:$0x3]  ;;  %v617_v57 = vadd.f32 %v690_v48, %v616_v55 }
 0x519   :  { %588 = vst [vmem:[#allocation1] ss:$4 sm:$0xff] %v551_v56 }
 0x51a   :  { %v628_v58 = vrot.slane %v617_v57, 2  ;;  %v629_v59 = vrot.slane %v617_v57, 4  ;;  %v630_v60 = vrot.slane %v617_v57, 6  ;;  %647 = vst [vmem:[#allocation12 + $0x8] sm:$0x3] %v617_v57 }
 0x51c   :  { %648 = vst [vmem:[#allocation12 + $0xa] sm:$0x3] %v628_v58 }
 0x51d   :  { %649 = vst [vmem:[#allocation12 + $0xc] sm:$0x3] %v629_v59 }
 0x51e   :  { %650 = vst [vmem:[#allocation12 + $0xe] sm:$0x3] %v630_v60 }
 0x594   :  { %v486_v62 = vpop.f32.mrf.mxu2 }
 0x595   :  { %v489_v63 = vadd.f32 %v486_v62, %v468_v61 }
 0x597   :  { %709 = vtanh.f32 %v489_v63 }
 0x59d   :  { %v710_v0 = vpop.eup %709 }
 0x59e   :  { %491 = vst [vmem:[#allocation2 + $0x12] sm:$0x3] %v710_v0  ;;  %510 = vmatmul.f32.vlgmr.msra.gmra.mxu3 %v710_v0 }
 0x5a5   :  { %v552_v5 = vld [vmem:[#allocation2 + $0x12] sm:$0x3] }
 0x5a6   :  { %589 = vst [vmem:[#allocation1 + $0x1] ss:$4 sm:$0xff] %v552_v5 }
 0x621   :  { %v511_v2 = vpop.f32.mrf.mxu3 }
 0x622   :  { %v514_v3 = vadd.f32 %v511_v2, %v493_v1 }
 0x624   :  { %711 = vtanh.f32 %v514_v3 }
 0x62a   :  { %v712_v4 = vpop.eup %711 }
 0x62b   :  { %516 = vst [vmem:[#allocation2 + $0x14] sm:$0x3] %v712_v4  ;;  %535 = vmatmul.f32.vlgmr.msrb.gmra.mxu0 %v712_v4 }
 0x632   :  { %v553_v6 = vld [vmem:[#allocation2 + $0x14] sm:$0x3] }
 0x633   :  { %590 = vst [vmem:[#allocation1 + $0x2] ss:$4 sm:$0xff] %v553_v6 }
 0x6a8   :  { %v536_v8 = vpop.f32.mrf.mxu0 }
 0x6a9   :  { %v539_v9 = vadd.f32 %v536_v8, %v518_v7 }
 0x6ab   :  { %713 = vtanh.f32 %v539_v9 }
 0x6b1   :  { %v714_v10 = vpop.eup %713 }
 0x6b2   :  { %541 = vst [vmem:[#allocation2 + $0x16] sm:$0x3] %v714_v10 }
 0x6b3   :  { %542 = vst [vmem:[#allocation3] sm:$0x3] %v714_v10 }
 0x6b9   :  { %v554_v11 = vld [vmem:[#allocation2 + $0x16] sm:$0x3] }
 0x6ba   :  { %591 = vst [vmem:[#allocation1 + $0x3] ss:$4 sm:$0xff] %v554_v11 }
 0x6c1   :  { %v592_v12 = vld.sshfl [vmem:[#allocation1] sm:$0xff pattern:$0x73625140] }
 0x6c2   :  { %618 = vmatmul.f32.gmra.mxu1 %v592_v12 }
 0x73f   :  { %v619_v13 = vpop.f32.mrf.mxu1 }
 0x740   :  { %v620_v14 = vadd.f32 %v690_v48, %v619_v13 }
 0x742   :  { %v631_v15 = vrot.slane %v620_v14, 2  ;;  %v632_v16 = vrot.slane %v620_v14, 4  ;;  %v633_v17 = vrot.slane %v620_v14, 6  ;;  %651 = vst [vmem:[#allocation12 + $0x10] sm:$0x3] %v620_v14 }
 0x744   :  { %652 = vst [vmem:[#allocation12 + $0x12] sm:$0x3] %v631_v15 }
 0x745   :  { %653 = vst [vmem:[#allocation12 + $0x14] sm:$0x3] %v632_v16 }
 0x746   :  { %654 = vst [vmem:[#allocation12 + $0x16] sm:$0x3] %v633_v17 }
 0x747   :  { %667 = dma.vmem_to_hbm [thread:$0]  %s660_s20, 384, %s662_s23, [#allocation6], %s847_s9, %s847_s9, %s848_s10  }
 0x748   :  { %841 = dma.done.wait [#allocation6], 384  }
 0x749   :  { %842 = vsyncadd [#allocation6], 4294966912 }
 0x74a   :  { %672 = vsyncpa [#allocation5], 1 }
 0x74b   :  { %673 = vsyncpa [#allocation8], 1 }
 0x74c   :  { %674 = vsyncpa [#allocation11], 1 }
 0x74d   :  { %675 = vsyncpa [#allocation6], 1 }

</bundles_post_ra>
